<compile_context>
chip_gen: v7x
topology: tpu7x:2x2x1
jax: 0.10.0
libtpu: 0.0.40
codegen_flags: <defaults>
</compile_context>

<pallas_src>
import math

import jax
import jax.numpy as jnp
from jax.experimental import pallas as pl
from jax.experimental.pallas import tpu as pltpu


def _round_up(v, m):
    return (v + m - 1) // m * m


def conv1d_relu_globalmaxpool(x, weight, bias, *, lane_chunk=None):
    """x: (N, 1, L); weight: (C_out, 1, K); bias: (C_out,)
    returns (N, C_out, 1)  ==  F.max_pool1d(F.relu(conv1d(x)), L_out)
    """
    N, C_in, L = x.shape
    assert C_in == 1, "module is Conv1d(in_channels=1, ...)"
    C_out, _, K = weight.shape
    L_out = L - K + 1          # stride=1, no padding (PyTorch Conv1d defaults)
    assert L_out >= 1

    out_dtype = jnp.promote_types(x.dtype, weight.dtype)

    # x stays in its source dtype (no full-array pre-cast pass); upcast happens per
    # tile inside the kernel.  Weights/bias are tiny -> f32 scalars in SMEM.
    x2 = x.reshape(N, L)
    w1 = weight.reshape(C_out * K).astype(jnp.float32)   # 1-D: tiny SMEM footprint
    b1 = bias.reshape(C_out).astype(jnp.float32)

    # --- batch tiling --------------------------------------------------------
    # TB rows per grid step.  For N > 8 guarantee >= 2 grid steps (v7x megacore via
    # dimension_semantics=("parallel",)) and keep TB a multiple of 8.  The last tile
    # may overhang the array: overhang rows only produce garbage in their own
    # (masked / discarded) outputs, so no wrapper-side full-array jnp.pad is needed.
    if N <= 8:
        TB = N                                   # block == full dim is legal
    else:
        TB = min(128, _round_up(-(-N // 2), 8))  # >= 2 tiles, lane/sublane friendly
    grid_n = -(-N // TB)                         # cdiv

    # --- spatial chunking ----------------------------------------------------
    # Running max over L_out in chunks of LC; keep the live (TB, LC) f32 chunk
    # accumulator <= ~32 vregs (TB * LC * 4 <= 128 KiB).
    if lane_chunk is None:
        LC = max(128, ((32 * 1024) // max(TB, 1)) // 128 * 128)
        LC = min(LC, 512)
    else:
        LC = int(lane_chunk)
    LC = max(1, min(LC, L_out))

    def kernel(x_ref, w_ref, b_ref, o_ref):
        # x_ref: (TB, L) VMEM (source dtype); w_ref: (C_out*K,) SMEM f32;
        # b_ref: (C_out,) SMEM f32; o_ref: (TB, C_out) VMEM.
        for c in range(C_out):                       # static unroll over channels
            m = jnp.full((TB, 1), -jnp.inf, dtype=jnp.float32)
            for start in range(0, L_out, LC):        # static chunk loop
                cur = min(LC, L_out - start)
                # K-tap scalar x vector MAC on the VPU (lane axis = spatial positions).
                # TODO(synk): on v6e/v7x with bf16 inputs the tap MAC could stay in
                # bf16 (2x VALU rate); kept in f32 here so v5e works unchanged.
                acc = w_ref[c * K] * x_ref[:, 0:cur].astype(jnp.float32) \
                    if start == 0 else \
                    w_ref[c * K] * x_ref[:, start:start + cur].astype(jnp.float32)
                for k in range(1, K):                # K is small & static
                    acc = acc + w_ref[c * K + k] * x_ref[
                        :, start + k:start + k + cur].astype(jnp.float32)
                m = jnp.maximum(m, jnp.max(acc, axis=1, keepdims=True))
            # bias + ReLU hoisted past the max (exact: bias constant over L, ReLU
            # monotone).  One tiny (TB, 1) column store per channel.
            o_ref[:, c:c + 1] = jnp.maximum(m + b_ref[c], 0.0).astype(o_ref.dtype)

    # VMEM budget: double-buffered x tile + double-buffered output tile + slack
    # (explicit so long-L inputs don't trip v5e's 16 MiB default scoped limit;
    # capped well inside v7x's 64 MiB physical VMEM).
    vmem_need = 2 * TB * L * x2.dtype.itemsize + 2 * TB * max(C_out, 128) * 4
    vmem_limit = int(min(max(vmem_need + (4 << 20), 8 << 20), 48 << 20))
    # TODO(synk): for very long L (x tile > ~20 MiB) add a grid axis over L with a
    # K-1 halo and carry the running max across it instead of one (TB, L) tile.

    out = pl.pallas_call(
        kernel,
        out_shape=jax.ShapeDtypeStruct((N, C_out), out_dtype),
        grid=(grid_n,),
        in_specs=[
            pl.BlockSpec((TB, L), lambda n: (n, 0)),                # x batch tile (VMEM)
            pl.BlockSpec(memory_space=pltpu.MemorySpace.SMEM),      # weights as scalars
            pl.BlockSpec(memory_space=pltpu.MemorySpace.SMEM),      # bias as scalars
        ],
        out_specs=pl.BlockSpec((TB, C_out), lambda n: (n, 0)),      # (batch, channel)
        compiler_params=pltpu.CompilerParams(
            dimension_semantics=("parallel",),
            vmem_limit_bytes=vmem_limit),
    )(x2, w1, b1)

    return out.reshape(N, C_out, 1)    # PyTorch layout; no transpose needed


def _reference(x, weight, bias):
    # pure-JAX reference for correctness checking
    N, _, L = x.shape
    C_out, _, K = weight.shape
    L_out = L - K + 1
    w2 = weight.reshape(C_out, K)
    patches = jnp.stack([x[:, 0, k:k + L_out] for k in range(K)], axis=-1)  # (N, L_out, K)
    y = jnp.einsum('nlk,ck->ncl', patches, w2) + bias[None, :, None]
    y = jnp.maximum(y, 0.0)
    return jnp.max(y, axis=2, keepdims=True)  # (N, C_out, 1)


if __name__ == "__main__":
    def make_inputs(key, N, L, C_out, K):
        kx, kw, kb = jax.random.split(key, 3)
        bound = 1.0 / math.sqrt(1 * K)   # PyTorch-like uniform init bound
        x = jax.random.normal(kx, (N, 1, L), dtype=jnp.float32)
        w = jax.random.uniform(kw, (C_out, 1, K), jnp.float32, -bound, bound)
        b = jax.random.uniform(kb, (C_out,), jnp.float32, -bound, bound)
        return x, w, b

    # 1) module-sized smoke test: Conv1d(1, 8, kernel_size=3) on x (2, 1, 16)
    x, w, b = make_inputs(jax.random.PRNGKey(0), N=2, L=16, C_out=8, K=3)
    out = jax.block_until_ready(conv1d_relu_globalmaxpool(x, w, b))
    assert out.shape == (2, 8, 1)
    assert jnp.allclose(out, _reference(x, w, b), atol=1e-5, rtol=1e-5)

    # 2) exercise the chunked running-max path (multiple spatial chunks + remainder)
    x, w, b = make_inputs(jax.random.PRNGKey(1), N=5, L=40, C_out=16, K=5)
    out = jax.block_until_ready(conv1d_relu_globalmaxpool(x, w, b, lane_chunk=8))
    assert jnp.allclose(out, _reference(x, w, b), atol=1e-5, rtol=1e-5)

    # 3) exercise batch tiling with a ragged (overhanging) last tile, no wrapper pad
    x, w, b = make_inputs(jax.random.PRNGKey(2), N=130, L=20, C_out=8, K=3)
    out = jax.block_until_ready(conv1d_relu_globalmaxpool(x, w, b))
    assert jnp.allclose(out, _reference(x, w, b), atol=1e-5, rtol=1e-5)

    print("KERNEL_OK")
</pallas_src>

<mosaic_0001>
module attributes {stable_mosaic.version = 11 : i64} {
  func.func @kernel(%arg0: i32, %arg1: memref<2x16xf32, #tpu.memory_space<vmem>>, %arg2: memref<24xf32, #tpu.memory_space<smem>>, %arg3: memref<8xf32, #tpu.memory_space<smem>>, %arg4: memref<2x8xf32, #tpu.memory_space<vmem>>) attributes {dimension_semantics = [#tpu.dimension_semantics<parallel>], iteration_bounds = array<i64: 1>, scalar_prefetch = 0 : i64, scratch_operands = 0 : i64, tpu.core_type = #tpu.core_type<tc>, window_params = [{transform_indices = @transform_0, window_bounds = array<i64: 2, 16>}, {transform_indices = @transform_1, window_bounds = array<i64: 24>}, {transform_indices = @transform_2, window_bounds = array<i64: 8>}, {transform_indices = @transform_3, window_bounds = array<i64: 2, 8>}]} {
    %cst = arith.constant 0xFF800000 : f32
    %0 = vector.broadcast %cst : f32 to vector<2x1xf32>
    %c0 = arith.constant 0 : index
    %1 = memref.load %arg2[%c0] : memref<24xf32, #tpu.memory_space<smem>>
    %c0_0 = arith.constant 0 : index
    %c0_1 = arith.constant 0 : index
    %2 = vector.load %arg1[%c0_0, %c0_1] : memref<2x16xf32, #tpu.memory_space<vmem>>, vector<2x14xf32>
    %3 = vector.broadcast %1 : f32 to vector<2x14xf32>
    %4 = arith.mulf %3, %2 : vector<2x14xf32>
    %c1 = arith.constant 1 : index
    %5 = memref.load %arg2[%c1] : memref<24xf32, #tpu.memory_space<smem>>
    %c0_2 = arith.constant 0 : index
    %c1_3 = arith.constant 1 : index
    %6 = vector.load %arg1[%c0_2, %c1_3] : memref<2x16xf32, #tpu.memory_space<vmem>>, vector<2x14xf32>
    %7 = vector.broadcast %5 : f32 to vector<2x14xf32>
    %8 = arith.mulf %7, %6 : vector<2x14xf32>
    %9 = arith.addf %4, %8 : vector<2x14xf32>
    %c2 = arith.constant 2 : index
    %10 = memref.load %arg2[%c2] : memref<24xf32, #tpu.memory_space<smem>>
    %c0_4 = arith.constant 0 : index
    %c2_5 = arith.constant 2 : index
    %11 = vector.load %arg1[%c0_4, %c2_5] : memref<2x16xf32, #tpu.memory_space<vmem>>, vector<2x14xf32>
    %12 = vector.broadcast %10 : f32 to vector<2x14xf32>
    %13 = arith.mulf %12, %11 : vector<2x14xf32>
    %14 = arith.addf %9, %13 : vector<2x14xf32>
    %cst_6 = arith.constant dense<0xFF800000> : vector<2xf32>
    %15 = vector.multi_reduction <maximumf>, %14, %cst_6 [1] : vector<2x14xf32> to vector<2xf32>
    %16 = vector.shape_cast %15 : vector<2xf32> to vector<2x1xf32>
    %17 = arith.maximumf %0, %16 : vector<2x1xf32>
    %c0_7 = arith.constant 0 : index
    %18 = memref.load %arg3[%c0_7] : memref<8xf32, #tpu.memory_space<smem>>
    %19 = vector.broadcast %18 : f32 to vector<2x1xf32>
    %20 = arith.addf %17, %19 : vector<2x1xf32>
    %cst_8 = arith.constant 0.000000e+00 : f32
    %21 = vector.broadcast %cst_8 : f32 to vector<2x1xf32>
    %22 = arith.maximumf %20, %21 : vector<2x1xf32>
    %c0_9 = arith.constant 0 : index
    %c0_10 = arith.constant 0 : index
    %23 = vector.load %arg4[%c0_9, %c0_10] : memref<2x8xf32, #tpu.memory_space<vmem>>, vector<2x1xf32>
    tpu.vector_store %arg4[%c0_9, %c0_10], %22 {strides = array<i32>} : memref<2x8xf32, #tpu.memory_space<vmem>>, vector<2x1xf32>,
    %cst_11 = arith.constant 0xFF800000 : f32
    %24 = vector.broadcast %cst_11 : f32 to vector<2x1xf32>
    %c3 = arith.constant 3 : index
    %25 = memref.load %arg2[%c3] : memref<24xf32, #tpu.memory_space<smem>>
    %c0_12 = arith.constant 0 : index
    %c0_13 = arith.constant 0 : index
    %26 = vector.load %arg1[%c0_12, %c0_13] : memref<2x16xf32, #tpu.memory_space<vmem>>, vector<2x14xf32>
    %27 = vector.broadcast %25 : f32 to vector<2x14xf32>
    %28 = arith.mulf %27, %26 : vector<2x14xf32>
    %c4 = arith.constant 4 : index
    %29 = memref.load %arg2[%c4] : memref<24xf32, #tpu.memory_space<smem>>
    %c0_14 = arith.constant 0 : index
    %c1_15 = arith.constant 1 : index
    %30 = vector.load %arg1[%c0_14, %c1_15] : memref<2x16xf32, #tpu.memory_space<vmem>>, vector<2x14xf32>
    %31 = vector.broadcast %29 : f32 to vector<2x14xf32>
    %32 = arith.mulf %31, %30 : vector<2x14xf32>
    %33 = arith.addf %28, %32 : vector<2x14xf32>
    %c5 = arith.constant 5 : index
    %34 = memref.load %arg2[%c5] : memref<24xf32, #tpu.memory_space<smem>>
    %c0_16 = arith.constant 0 : index
    %c2_17 = arith.constant 2 : index
    %35 = vector.load %arg1[%c0_16, %c2_17] : memref<2x16xf32, #tpu.memory_space<vmem>>, vector<2x14xf32>
    %36 = vector.broadcast %34 : f32 to vector<2x14xf32>
    %37 = arith.mulf %36, %35 : vector<2x14xf32>
    %38 = arith.addf %33, %37 : vector<2x14xf32>
    %cst_18 = arith.constant dense<0xFF800000> : vector<2xf32>
    %39 = vector.multi_reduction <maximumf>, %38, %cst_18 [1] : vector<2x14xf32> to vector<2xf32>
    %40 = vector.shape_cast %39 : vector<2xf32> to vector<2x1xf32>
    %41 = arith.maximumf %24, %40 : vector<2x1xf32>
    %c1_19 = arith.constant 1 : index
    %42 = memref.load %arg3[%c1_19] : memref<8xf32, #tpu.memory_space<smem>>
    %43 = vector.broadcast %42 : f32 to vector<2x1xf32>
    %44 = arith.addf %41, %43 : vector<2x1xf32>
    %cst_20 = arith.constant 0.000000e+00 : f32
    %45 = vector.broadcast %cst_20 : f32 to vector<2x1xf32>
    %46 = arith.maximumf %44, %45 : vector<2x1xf32>
    %c0_21 = arith.constant 0 : index
    %c1_22 = arith.constant 1 : index
    %47 = vector.load %arg4[%c0_21, %c1_22] : memref<2x8xf32, #tpu.memory_space<vmem>>, vector<2x1xf32>
    tpu.vector_store %arg4[%c0_21, %c1_22], %46 {strides = array<i32>} : memref<2x8xf32, #tpu.memory_space<vmem>>, vector<2x1xf32>,
    %cst_23 = arith.constant 0xFF800000 : f32
    %48 = vector.broadcast %cst_23 : f32 to vector<2x1xf32>
    %c6 = arith.constant 6 : index
    %49 = memref.load %arg2[%c6] : memref<24xf32, #tpu.memory_space<smem>>
    %c0_24 = arith.constant 0 : index
    %c0_25 = arith.constant 0 : index
    %50 = vector.load %arg1[%c0_24, %c0_25] : memref<2x16xf32, #tpu.memory_space<vmem>>, vector<2x14xf32>
    %51 = vector.broadcast %49 : f32 to vector<2x14xf32>
    %52 = arith.mulf %51, %50 : vector<2x14xf32>
    %c7 = arith.constant 7 : index
    %53 = memref.load %arg2[%c7] : memref<24xf32, #tpu.memory_space<smem>>
    %c0_26 = arith.constant 0 : index
    %c1_27 = arith.constant 1 : index
    %54 = vector.load %arg1[%c0_26, %c1_27] : memref<2x16xf32, #tpu.memory_space<vmem>>, vector<2x14xf32>
    %55 = vector.broadcast %53 : f32 to vector<2x14xf32>
    %56 = arith.mulf %55, %54 : vector<2x14xf32>
    %57 = arith.addf %52, %56 : vector<2x14xf32>
    %c8 = arith.constant 8 : index
    %58 = memref.load %arg2[%c8] : memref<24xf32, #tpu.memory_space<smem>>
    %c0_28 = arith.constant 0 : index
    %c2_29 = arith.constant 2 : index
    %59 = vector.load %arg1[%c0_28, %c2_29] : memref<2x16xf32, #tpu.memory_space<vmem>>, vector<2x14xf32>
    %60 = vector.broadcast %58 : f32 to vector<2x14xf32>
    %61 = arith.mulf %60, %59 : vector<2x14xf32>
    %62 = arith.addf %57, %61 : vector<2x14xf32>
    %cst_30 = arith.constant dense<0xFF800000> : vector<2xf32>
    %63 = vector.multi_reduction <maximumf>, %62, %cst_30 [1] : vector<2x14xf32> to vector<2xf32>
    %64 = vector.shape_cast %63 : vector<2xf32> to vector<2x1xf32>
    %65 = arith.maximumf %48, %64 : vector<2x1xf32>
    %c2_31 = arith.constant 2 : index
    %66 = memref.load %arg3[%c2_31] : memref<8xf32, #tpu.memory_space<smem>>
    %67 = vector.broadcast %66 : f32 to vector<2x1xf32>
    %68 = arith.addf %65, %67 : vector<2x1xf32>
    %cst_32 = arith.constant 0.000000e+00 : f32
    %69 = vector.broadcast %cst_32 : f32 to vector<2x1xf32>
    %70 = arith.maximumf %68, %69 : vector<2x1xf32>
    %c0_33 = arith.constant 0 : index
    %c2_34 = arith.constant 2 : index
    %71 = vector.load %arg4[%c0_33, %c2_34] : memref<2x8xf32, #tpu.memory_space<vmem>>, vector<2x1xf32>
    tpu.vector_store %arg4[%c0_33, %c2_34], %70 {strides = array<i32>} : memref<2x8xf32, #tpu.memory_space<vmem>>, vector<2x1xf32>,
    %cst_35 = arith.constant 0xFF800000 : f32
    %72 = vector.broadcast %cst_35 : f32 to vector<2x1xf32>
    %c9 = arith.constant 9 : index
    %73 = memref.load %arg2[%c9] : memref<24xf32, #tpu.memory_space<smem>>
    %c0_36 = arith.constant 0 : index
    %c0_37 = arith.constant 0 : index
    %74 = vector.load %arg1[%c0_36, %c0_37] : memref<2x16xf32, #tpu.memory_space<vmem>>, vector<2x14xf32>
    %75 = vector.broadcast %73 : f32 to vector<2x14xf32>
    %76 = arith.mulf %75, %74 : vector<2x14xf32>
    %c10 = arith.constant 10 : index
    %77 = memref.load %arg2[%c10] : memref<24xf32, #tpu.memory_space<smem>>
    %c0_38 = arith.constant 0 : index
    %c1_39 = arith.constant 1 : index
    %78 = vector.load %arg1[%c0_38, %c1_39] : memref<2x16xf32, #tpu.memory_space<vmem>>, vector<2x14xf32>
    %79 = vector.broadcast %77 : f32 to vector<2x14xf32>
    %80 = arith.mulf %79, %78 : vector<2x14xf32>
    %81 = arith.addf %76, %80 : vector<2x14xf32>
    %c11 = arith.constant 11 : index
    %82 = memref.load %arg2[%c11] : memref<24xf32, #tpu.memory_space<smem>>
    %c0_40 = arith.constant 0 : index
    %c2_41 = arith.constant 2 : index
    %83 = vector.load %arg1[%c0_40, %c2_41] : memref<2x16xf32, #tpu.memory_space<vmem>>, vector<2x14xf32>
    %84 = vector.broadcast %82 : f32 to vector<2x14xf32>
    %85 = arith.mulf %84, %83 : vector<2x14xf32>
    %86 = arith.addf %81, %85 : vector<2x14xf32>
    %cst_42 = arith.constant dense<0xFF800000> : vector<2xf32>
    %87 = vector.multi_reduction <maximumf>, %86, %cst_42 [1] : vector<2x14xf32> to vector<2xf32>
    %88 = vector.shape_cast %87 : vector<2xf32> to vector<2x1xf32>
    %89 = arith.maximumf %72, %88 : vector<2x1xf32>
    %c3_43 = arith.constant 3 : index
    %90 = memref.load %arg3[%c3_43] : memref<8xf32, #tpu.memory_space<smem>>
    %91 = vector.broadcast %90 : f32 to vector<2x1xf32>
    %92 = arith.addf %89, %91 : vector<2x1xf32>
    %cst_44 = arith.constant 0.000000e+00 : f32
    %93 = vector.broadcast %cst_44 : f32 to vector<2x1xf32>
    %94 = arith.maximumf %92, %93 : vector<2x1xf32>
    %c0_45 = arith.constant 0 : index
    %c3_46 = arith.constant 3 : index
    %95 = vector.load %arg4[%c0_45, %c3_46] : memref<2x8xf32, #tpu.memory_space<vmem>>, vector<2x1xf32>
    tpu.vector_store %arg4[%c0_45, %c3_46], %94 {strides = array<i32>} : memref<2x8xf32, #tpu.memory_space<vmem>>, vector<2x1xf32>,
    %cst_47 = arith.constant 0xFF800000 : f32
    %96 = vector.broadcast %cst_47 : f32 to vector<2x1xf32>
    %c12 = arith.constant 12 : index
    %97 = memref.load %arg2[%c12] : memref<24xf32, #tpu.memory_space<smem>>
    %c0_48 = arith.constant 0 : index
    %c0_49 = arith.constant 0 : index
    %98 = vector.load %arg1[%c0_48, %c0_49] : memref<2x16xf32, #tpu.memory_space<vmem>>, vector<2x14xf32>
    %99 = vector.broadcast %97 : f32 to vector<2x14xf32>
    %100 = arith.mulf %99, %98 : vector<2x14xf32>
    %c13 = arith.constant 13 : index
    %101 = memref.load %arg2[%c13] : memref<24xf32, #tpu.memory_space<smem>>
    %c0_50 = arith.constant 0 : index
    %c1_51 = arith.constant 1 : index
    %102 = vector.load %arg1[%c0_50, %c1_51] : memref<2x16xf32, #tpu.memory_space<vmem>>, vector<2x14xf32>
    %103 = vector.broadcast %101 : f32 to vector<2x14xf32>
    %104 = arith.mulf %103, %102 : vector<2x14xf32>
    %105 = arith.addf %100, %104 : vector<2x14xf32>
    %c14 = arith.constant 14 : index
    %106 = memref.load %arg2[%c14] : memref<24xf32, #tpu.memory_space<smem>>
    %c0_52 = arith.constant 0 : index
    %c2_53 = arith.constant 2 : index
    %107 = vector.load %arg1[%c0_52, %c2_53] : memref<2x16xf32, #tpu.memory_space<vmem>>, vector<2x14xf32>
    %108 = vector.broadcast %106 : f32 to vector<2x14xf32>
    %109 = arith.mulf %108, %107 : vector<2x14xf32>
    %110 = arith.addf %105, %109 : vector<2x14xf32>
    %cst_54 = arith.constant dense<0xFF800000> : vector<2xf32>
    %111 = vector.multi_reduction <maximumf>, %110, %cst_54 [1] : vector<2x14xf32> to vector<2xf32>
    %112 = vector.shape_cast %111 : vector<2xf32> to vector<2x1xf32>
    %113 = arith.maximumf %96, %112 : vector<2x1xf32>
    %c4_55 = arith.constant 4 : index
    %114 = memref.load %arg3[%c4_55] : memref<8xf32, #tpu.memory_space<smem>>
    %115 = vector.broadcast %114 : f32 to vector<2x1xf32>
    %116 = arith.addf %113, %115 : vector<2x1xf32>
    %cst_56 = arith.constant 0.000000e+00 : f32
    %117 = vector.broadcast %cst_56 : f32 to vector<2x1xf32>
    %118 = arith.maximumf %116, %117 : vector<2x1xf32>
    %c0_57 = arith.constant 0 : index
    %c4_58 = arith.constant 4 : index
    %119 = vector.load %arg4[%c0_57, %c4_58] : memref<2x8xf32, #tpu.memory_space<vmem>>, vector<2x1xf32>
    tpu.vector_store %arg4[%c0_57, %c4_58], %118 {strides = array<i32>} : memref<2x8xf32, #tpu.memory_space<vmem>>, vector<2x1xf32>,
    %cst_59 = arith.constant 0xFF800000 : f32
    %120 = vector.broadcast %cst_59 : f32 to vector<2x1xf32>
    %c15 = arith.constant 15 : index
    %121 = memref.load %arg2[%c15] : memref<24xf32, #tpu.memory_space<smem>>
    %c0_60 = arith.constant 0 : index
    %c0_61 = arith.constant 0 : index
    %122 = vector.load %arg1[%c0_60, %c0_61] : memref<2x16xf32, #tpu.memory_space<vmem>>, vector<2x14xf32>
    %123 = vector.broadcast %121 : f32 to vector<2x14xf32>
    %124 = arith.mulf %123, %122 : vector<2x14xf32>
    %c16 = arith.constant 16 : index
    %125 = memref.load %arg2[%c16] : memref<24xf32, #tpu.memory_space<smem>>
    %c0_62 = arith.constant 0 : index
    %c1_63 = arith.constant 1 : index
    %126 = vector.load %arg1[%c0_62, %c1_63] : memref<2x16xf32, #tpu.memory_space<vmem>>, vector<2x14xf32>
    %127 = vector.broadcast %125 : f32 to vector<2x14xf32>
    %128 = arith.mulf %127, %126 : vector<2x14xf32>
    %129 = arith.addf %124, %128 : vector<2x14xf32>
    %c17 = arith.constant 17 : index
    %130 = memref.load %arg2[%c17] : memref<24xf32, #tpu.memory_space<smem>>
    %c0_64 = arith.constant 0 : index
    %c2_65 = arith.constant 2 : index
    %131 = vector.load %arg1[%c0_64, %c2_65] : memref<2x16xf32, #tpu.memory_space<vmem>>, vector<2x14xf32>
    %132 = vector.broadcast %130 : f32 to vector<2x14xf32>
    %133 = arith.mulf %132, %131 : vector<2x14xf32>
    %134 = arith.addf %129, %133 : vector<2x14xf32>
    %cst_66 = arith.constant dense<0xFF800000> : vector<2xf32>
    %135 = vector.multi_reduction <maximumf>, %134, %cst_66 [1] : vector<2x14xf32> to vector<2xf32>
    %136 = vector.shape_cast %135 : vector<2xf32> to vector<2x1xf32>
    %137 = arith.maximumf %120, %136 : vector<2x1xf32>
    %c5_67 = arith.constant 5 : index
    %138 = memref.load %arg3[%c5_67] : memref<8xf32, #tpu.memory_space<smem>>
    %139 = vector.broadcast %138 : f32 to vector<2x1xf32>
    %140 = arith.addf %137, %139 : vector<2x1xf32>
    %cst_68 = arith.constant 0.000000e+00 : f32
    %141 = vector.broadcast %cst_68 : f32 to vector<2x1xf32>
    %142 = arith.maximumf %140, %141 : vector<2x1xf32>
    %c0_69 = arith.constant 0 : index
    %c5_70 = arith.constant 5 : index
    %143 = vector.load %arg4[%c0_69, %c5_70] : memref<2x8xf32, #tpu.memory_space<vmem>>, vector<2x1xf32>
    tpu.vector_store %arg4[%c0_69, %c5_70], %142 {strides = array<i32>} : memref<2x8xf32, #tpu.memory_space<vmem>>, vector<2x1xf32>,
    %cst_71 = arith.constant 0xFF800000 : f32
    %144 = vector.broadcast %cst_71 : f32 to vector<2x1xf32>
    %c18 = arith.constant 18 : index
    %145 = memref.load %arg2[%c18] : memref<24xf32, #tpu.memory_space<smem>>
    %c0_72 = arith.constant 0 : index
    %c0_73 = arith.constant 0 : index
    %146 = vector.load %arg1[%c0_72, %c0_73] : memref<2x16xf32, #tpu.memory_space<vmem>>, vector<2x14xf32>
    %147 = vector.broadcast %145 : f32 to vector<2x14xf32>
    %148 = arith.mulf %147, %146 : vector<2x14xf32>
    %c19 = arith.constant 19 : index
    %149 = memref.load %arg2[%c19] : memref<24xf32, #tpu.memory_space<smem>>
    %c0_74 = arith.constant 0 : index
    %c1_75 = arith.constant 1 : index
    %150 = vector.load %arg1[%c0_74, %c1_75] : memref<2x16xf32, #tpu.memory_space<vmem>>, vector<2x14xf32>
    %151 = vector.broadcast %149 : f32 to vector<2x14xf32>
    %152 = arith.mulf %151, %150 : vector<2x14xf32>
    %153 = arith.addf %148, %152 : vector<2x14xf32>
    %c20 = arith.constant 20 : index
    %154 = memref.load %arg2[%c20] : memref<24xf32, #tpu.memory_space<smem>>
    %c0_76 = arith.constant 0 : index
    %c2_77 = arith.constant 2 : index
    %155 = vector.load %arg1[%c0_76, %c2_77] : memref<2x16xf32, #tpu.memory_space<vmem>>, vector<2x14xf32>
    %156 = vector.broadcast %154 : f32 to vector<2x14xf32>
    %157 = arith.mulf %156, %155 : vector<2x14xf32>
    %158 = arith.addf %153, %157 : vector<2x14xf32>
    %cst_78 = arith.constant dense<0xFF800000> : vector<2xf32>
    %159 = vector.multi_reduction <maximumf>, %158, %cst_78 [1] : vector<2x14xf32> to vector<2xf32>
    %160 = vector.shape_cast %159 : vector<2xf32> to vector<2x1xf32>
    %161 = arith.maximumf %144, %160 : vector<2x1xf32>
    %c6_79 = arith.constant 6 : index
    %162 = memref.load %arg3[%c6_79] : memref<8xf32, #tpu.memory_space<smem>>
    %163 = vector.broadcast %162 : f32 to vector<2x1xf32>
    %164 = arith.addf %161, %163 : vector<2x1xf32>
    %cst_80 = arith.constant 0.000000e+00 : f32
    %165 = vector.broadcast %cst_80 : f32 to vector<2x1xf32>
    %166 = arith.maximumf %164, %165 : vector<2x1xf32>
    %c0_81 = arith.constant 0 : index
    %c6_82 = arith.constant 6 : index
    %167 = vector.load %arg4[%c0_81, %c6_82] : memref<2x8xf32, #tpu.memory_space<vmem>>, vector<2x1xf32>
    tpu.vector_store %arg4[%c0_81, %c6_82], %166 {strides = array<i32>} : memref<2x8xf32, #tpu.memory_space<vmem>>, vector<2x1xf32>,
    %cst_83 = arith.constant 0xFF800000 : f32
    %168 = vector.broadcast %cst_83 : f32 to vector<2x1xf32>
    %c21 = arith.constant 21 : index
    %169 = memref.load %arg2[%c21] : memref<24xf32, #tpu.memory_space<smem>>
    %c0_84 = arith.constant 0 : index
    %c0_85 = arith.constant 0 : index
    %170 = vector.load %arg1[%c0_84, %c0_85] : memref<2x16xf32, #tpu.memory_space<vmem>>, vector<2x14xf32>
    %171 = vector.broadcast %169 : f32 to vector<2x14xf32>
    %172 = arith.mulf %171, %170 : vector<2x14xf32>
    %c22 = arith.constant 22 : index
    %173 = memref.load %arg2[%c22] : memref<24xf32, #tpu.memory_space<smem>>
    %c0_86 = arith.constant 0 : index
    %c1_87 = arith.constant 1 : index
    %174 = vector.load %arg1[%c0_86, %c1_87] : memref<2x16xf32, #tpu.memory_space<vmem>>, vector<2x14xf32>
    %175 = vector.broadcast %173 : f32 to vector<2x14xf32>
    %176 = arith.mulf %175, %174 : vector<2x14xf32>
    %177 = arith.addf %172, %176 : vector<2x14xf32>
    %c23 = arith.constant 23 : index
    %178 = memref.load %arg2[%c23] : memref<24xf32, #tpu.memory_space<smem>>
    %c0_88 = arith.constant 0 : index
    %c2_89 = arith.constant 2 : index
    %179 = vector.load %arg1[%c0_88, %c2_89] : memref<2x16xf32, #tpu.memory_space<vmem>>, vector<2x14xf32>
    %180 = vector.broadcast %178 : f32 to vector<2x14xf32>
    %181 = arith.mulf %180, %179 : vector<2x14xf32>
    %182 = arith.addf %177, %181 : vector<2x14xf32>
    %cst_90 = arith.constant dense<0xFF800000> : vector<2xf32>
    %183 = vector.multi_reduction <maximumf>, %182, %cst_90 [1] : vector<2x14xf32> to vector<2xf32>
    %184 = vector.shape_cast %183 : vector<2xf32> to vector<2x1xf32>
    %185 = arith.maximumf %168, %184 : vector<2x1xf32>
    %c7_91 = arith.constant 7 : index
    %186 = memref.load %arg3[%c7_91] : memref<8xf32, #tpu.memory_space<smem>>
    %187 = vector.broadcast %186 : f32 to vector<2x1xf32>
    %188 = arith.addf %185, %187 : vector<2x1xf32>
    %cst_92 = arith.constant 0.000000e+00 : f32
    %189 = vector.broadcast %cst_92 : f32 to vector<2x1xf32>
    %190 = arith.maximumf %188, %189 : vector<2x1xf32>
    %c0_93 = arith.constant 0 : index
    %c7_94 = arith.constant 7 : index
    %191 = vector.load %arg4[%c0_93, %c7_94] : memref<2x8xf32, #tpu.memory_space<vmem>>, vector<2x1xf32>
    tpu.vector_store %arg4[%c0_93, %c7_94], %190 {strides = array<i32>} : memref<2x8xf32, #tpu.memory_space<vmem>>, vector<2x1xf32>,
    return
  }
  func.func @transform_0(%arg0: i32) -> (i32, i32) {
    %c0_i32 = arith.constant 0 : i32
    %c0_i32_0 = arith.constant 0 : i32
    return %arg0, %c0_i32 : i32, i32
  }
  func.func @transform_1(%arg0: i32) -> i32 {
    %c0_i32 = arith.constant 0 : i32
    %c0_i32_0 = arith.constant 0 : i32
    return %c0_i32 : i32
  }
  func.func @transform_2(%arg0: i32) -> i32 {
    %c0_i32 = arith.constant 0 : i32
    %c0_i32_0 = arith.constant 0 : i32
    return %c0_i32 : i32
  }
  func.func @transform_3(%arg0: i32) -> (i32, i32) {
    %c0_i32 = arith.constant 0 : i32
    %c0_i32_0 = arith.constant 0 : i32
    return %arg0, %c0_i32 : i32, i32
  }
}

</mosaic_0001>

<bundles_post_ra>
// kernel: tpu_custom_call.1
= control target key start
LH: loop header
LB: loop body
LE: loop exit
PB: predicated region body
PF: predicated region fallthrough
CT: control target
= control target key end

     0   :  { %8 = vsyncpa [#allocation3], 0  ;;  %s534_s0 = inlined_call_operand.hbm [shape: f32[2,16], index: 0, kind: input, shape index: {}]   ;;  %s535_s1 = inlined_call_operand.vmem [shape: f32[24], index: 1, kind: input, shape index: {}]   ;;  %s536_s2 = inlined_call_operand.vmem [shape: f32[8], index: 2, kind: input, shape index: {}]   ;;  %s537_s3 = inlined_call_operand.hbm [shape: f32[2,8], index: 3, kind: output, shape index: {}]  }
   0x1   :  { %9 = vsyncpa [#allocation5], 0 }
   0x2   :  { %10 = vsyncpa [#allocation8], 0 }
   0x3   :  { %11 = vsyncpa [#allocation4], 0  ;;  %s28_s14 = sshll.u32 %s535_s1, 4  ;;  %s414_s15 = smov [#allocation2]   ;;  %s29_s14 = int_to_ptr.vmem [resolvable:$true] %s28_s14 }
   0x4   :  { %s18_s16 = sshll.u32 %s414_s15, 4  ;;  %s338_s19 = scalar_lea.hbm %s534_s0, 32  ;;  %s19_s16 = int_to_ptr.vmem [resolvable:$true] %s18_s16 }
   0x5   :  { %p339_p0 = scmp.ne.s32.totalorder %s534_s0, %s338_s19  ;;  %p342_p1 = scmp.lt.u32.totalorder %s338_s19, %s534_s0 }
   0x7   :  { %p344_p2 = pnand %p342_p1, %p339_p0 }
   0x9   :  { %347 = shalt.err (!%p344_p2)
}
   0xa   :  { %s348_s24 = scalar_lea.vmem %s19_s16, 32  ;;  %p353_p4 = scmp.lt.s32.totalorder %s19_s16, %s19_s16 }
   0xb   :  { %p349_p3 = scmp.ne.s32.totalorder %s19_s16, %s348_s24  ;;  %p354_p5 = scmp.lt.s32.totalorder %s348_s24, %s348_s24 }
   0xd   :  { %p355_p6 = por %p354_p5, %p353_p4 }
   0xf   :  { %p356_p7 = pnand %p355_p6, %p349_p3 }
  0x11   :  { %359 = shalt.err (!%p356_p7)
}
  0x12   :  { %21 = dma.hbm_to_vmem [thread:$0]  %s534_s0, 32, %s19_s16, [#allocation3]  }
  0x13   :  { %s360_s26 = scalar_lea.vmem %s29_s14, 16  ;;  %p365_p9 = scmp.lt.s32.totalorder %s29_s14, %s29_s14 }
  0x14   :  { %p361_p8 = scmp.ne.s32.totalorder %s29_s14, %s360_s26  ;;  %p366_p10 = scmp.lt.s32.totalorder %s360_s26, %s360_s26 }
  0x16   :  { %p367_p11 = por %p366_p10, %p365_p9 }
  0x18   :  { %p368_p12 = pnand %p367_p11, %p361_p8 }
  0x1a   :  { %371 = shalt.err (!%p368_p12)
}
  0x1b   :  { %s415_s27 = smov [#allocation6]   ;;  %s38_s30 = sshll.u32 %s536_s2, 4  ;;  %s39_s30 = int_to_ptr.vmem [resolvable:$true] %s38_s30 }
  0x1c   :  { %31 = dma.vmem_to_smem %s29_s14, 16, %s415_s27, [#allocation5]  }
  0x1d   :  { %s372_s4 = scalar_lea.vmem %s39_s30, 16  ;;  %p377_p0 = scmp.lt.s32.totalorder %s39_s30, %s39_s30 }
  0x1e   :  { %p373_p13 = scmp.ne.s32.totalorder %s39_s30, %s372_s4  ;;  %p378_p1 = scmp.lt.s32.totalorder %s372_s4, %s372_s4 }
  0x20   :  { %p379_p2 = por %p378_p1, %p377_p0 }
  0x22   :  { %p380_p3 = pnand %p379_p2, %p373_p13 }
  0x24   :  { %383 = shalt.err (!%p380_p3)
}
  0x25   :  { %s416_s0 = smov [#allocation7]  }
  0x26   :  { %41 = dma.vmem_to_smem %s39_s30, 16, %s416_s0, [#allocation8]  }
  0x27   :  { %406 = dma.done.wait [#allocation3], 32  }
  0x28   :  { %407 = vsyncadd [#allocation3], 4294967264 }
  0x29   :  { %408 = dma.done.wait [#allocation5], 16  }
  0x2a   :  { %409 = vsyncadd [#allocation5], 4294967280 }
  0x2b   :  { %410 = dma.done.wait [#allocation8], 16  }
  0x2c   :  { %411 = vsyncadd [#allocation8], 4294967280 }
  0x2d   :  { %51 = sfence }
  0x2e   :  { %s302_s5 = sld [smem:[#allocation6 + $0x1]]  ;;  %s305_s6 = sld [smem:[#allocation6 + $0x4]]  ;;  %v458_v0 = vld [vmem:[#allocation2] sm:$0x3]  ;;  %vm72_vm0 = vcmask 107520   ;;  %vm80_vm1 = vcmask 1024  }
  0x2f   :  { %s303_s2 = sld [smem:[#allocation6 + $0x2]]  ;;  %s309_s7 = sld [smem:[#allocation6 + $0x7]]  ;;  %v460_v1 = vld [vmem:[#allocation2] sm:$0x3]  ;;  %vm109_vm2 = vcmask 9224   ;;  %vm138_vm3 = vcmask 17424  }
  0x30   :  { %s306_s8 = sld [smem:[#allocation6 + $0x5]]  ;;  %s310_s9 = sld [smem:[#allocation6 + $0x8]]  ;;  %v463_v6 = vld [vmem:[#allocation2] sm:$0x3]  ;;  %vm167_vm4 = vcmask 25624   ;;  %vm196_vm5 = vcmask 33824  }
  0x31   :  { %s313_s10 = sld [smem:[#allocation6 + $0xa]]  ;;  %s314_s11 = sld [smem:[#allocation6 + $0xb]]  ;;  %v474_v15 = vld [vmem:[#allocation2] sm:$0x3]  ;;  %vm225_vm6 = vcmask 42024   ;;  %vm254_vm7 = vcmask 50224  }
  0x32   :  { %s417_s12 = smov 127   ;;  %s317_s13 = sld [smem:[#allocation6 + $0xd]]  ;;  %v480_v20 = vld [vmem:[#allocation2] sm:$0x3]  ;;  %vm283_vm8 = vcmask 58424  }
  0x33   :  { %s329_s14 = sld [smem:[#allocation6 + $0x16]]  ;;  %s418_s15 = smov 126   ;;  %v482_v22 = vld [vmem:[#allocation2] sm:$0x3] }
  0x34   :  { %v57_v2 = vstv %s302_s5  ;;  %v87_v4 = vstv %s305_s6  ;;  %s321_s16 = sld [smem:[#allocation6 + $0x10]]  ;;  %s330_s17 = sld [smem:[#allocation6 + $0x17]]  ;;  %v487_v25 = vld [vmem:[#allocation2] sm:$0x3] }
  0x35   :  { %v58_v3 = vmul.f32 %v57_v2, %v458_v0  ;;  %v65_v5 = vstv %s303_s2  ;;  %v88_v7 = vmul.f32 %v87_v4, %v460_v1  ;;  %v116_v8 = vstv %s309_s7  ;;  %s318_s18 = sld [smem:[#allocation6 + $0xe]]  ;;  %s325_s19 = sld [smem:[#allocation6 + $0x13]]  ;;  %v496_v33 = vld [vmem:[#allocation2] sm:$0x3] }
  0x36   :  { %v66_v9 = vmul.f32 %v65_v5, %v458_v0  ;;  %v117_v10 = vmul.f32 %v116_v8, %v463_v6  ;;  %v95_v11 = vstv %s306_s8  ;;  %v124_v12 = vstv %s310_s9  ;;  %s322_s20 = sld [smem:[#allocation6 + $0x11]]  ;;  %s326_s21 = sld [smem:[#allocation6 + $0x14]] }
  0x37   :  { %60 = vrot.lane.b32.xlu0 %v58_v3, %s417_s12  ;;  %90 = vrot.lane.b32.xlu1 %v88_v7, %s417_s12  ;;  %v96_v13 = vmul.f32 %v95_v11, %v460_v1  ;;  %v125_v14 = vmul.f32 %v124_v12, %v463_v6  ;;  %v145_v16 = vstv %s313_s10  ;;  %v153_v17 = vstv %s314_s11  ;;  %s52_s22 = sld [smem:[#allocation6]]  ;;  %s304_s23 = sld [smem:[#allocation6 + $0x3]] }
  0x38   :  { %v146_v18 = vmul.f32 %v145_v16, %v474_v15  ;;  %v154_v19 = vmul.f32 %v153_v17, %v474_v15  ;;  %v174_v21 = vstv %s317_s13  ;;  %s308_s24 = sld [smem:[#allocation6 + $0x6]]  ;;  %s312_s1 = sld [smem:[#allocation6 + $0x9]] }
  0x39   :  { %v261_v23 = vstv %s329_s14  ;;  %v175_v24 = vmul.f32 %v174_v21, %v480_v20  ;;  %s328_s25 = sld [smem:[#allocation6 + $0x15]]  ;;  %s316_s26 = sld [smem:[#allocation6 + $0xc]] }
  0x3a   :  { %v203_v26 = vstv %s321_s16  ;;  %v262_v27 = vmul.f32 %v261_v23, %v482_v22  ;;  %v269_v28 = vstv %s330_s17  ;;  %s320_s27 = sld [smem:[#allocation6 + $0xf]]  ;;  %s324_s28 = sld [smem:[#allocation6 + $0x12]] }
  0x3b   :  { %68 = vrot.lane.b32.xlu0 %v66_v9, %s418_s15  ;;  %119 = vrot.lane.b32.xlu1 %v117_v10, %s417_s12  ;;  %v204_v29 = vmul.f32 %v203_v26, %v487_v25  ;;  %v182_v30 = vstv %s318_s18  ;;  %v270_v31 = vmul.f32 %v269_v28, %v482_v22  ;;  %v232_v34 = vstv %s325_s19  ;;  %s76_s29 = sld [smem:[#allocation7]]  ;;  %s307_s30 = sld [smem:[#allocation7 + $0x1]] }
  0x3c   :  { %v183_v32 = vmul.f32 %v182_v30, %v480_v20  ;;  %v233_v35 = vmul.f32 %v232_v34, %v496_v33  ;;  %v211_v36 = vstv %s322_s20  ;;  %v240_v38 = vstv %s326_s21  ;;  %s311_s4 = sld [smem:[#allocation7 + $0x2]]  ;;  %s315_s0 = sld [smem:[#allocation7 + $0x3]] }
  0x3d   :  { %v212_v37 = vmul.f32 %v211_v36, %v487_v25  ;;  %v241_v39 = vmul.f32 %v240_v38, %v496_v33  ;;  %v54_v40 = vstv %s52_s22  ;;  %v84_v41 = vstv %s304_s23  ;;  %s319_s5 = sld [smem:[#allocation7 + $0x4]]  ;;  %s323_s6 = sld [smem:[#allocation7 + $0x5]] }
  0x3e   :  { %v55_v42 = vmul.f32 %v54_v40, %v458_v0  ;;  %v113_v43 = vstv %s308_s24  ;;  %v85_v45 = vmul.f32 %v84_v41, %v460_v1  ;;  %v142_v54 = vstv %s312_s1  ;;  %s331_s2 = sld [smem:[#allocation7 + $0x7]]  ;;  %s327_s7 = sld [smem:[#allocation7 + $0x6]] }
  0x3f   :  { %98 = vrot.lane.b32.xlu0 %v96_v13, %s418_s15  ;;  %127 = vrot.lane.b32.xlu1 %v125_v14, %s418_s15  ;;  %v114_v47 = vmul.f32 %v113_v43, %v463_v6  ;;  %v143_v59 = vmul.f32 %v142_v54, %v474_v15  ;;  %v258_v2 = vstv %s328_s25  ;;  %v171_v4 = vstv %s316_s26  ;;  %s419_s8 = smov [#allocation9]  }
  0x40   :  { %v259_v7 = vmul.f32 %v258_v2, %v482_v22  ;;  %v172_v9 = vmul.f32 %v171_v4, %v480_v20  ;;  %v200_v14 = vstv %s320_s27  ;;  %v229_v21 = vstv %s324_s28  ;;  %s291_s9 = sshll.u32 %s419_s8, 4  ;;  %s292_s9 = int_to_ptr.vmem [resolvable:$true] %s291_s9 }
  0x41   :  { %v230_v20 = vmul.f32 %v229_v21, %v496_v33  ;;  %v106_v33 = vstv %s307_s30  ;;  %s384_s10 = scalar_lea.vmem %s292_s9, 32  ;;  %p389_p5 = scmp.lt.s32.totalorder %s292_s9, %s292_s9 }
  0x42   :  { %p385_p4 = scmp.ne.s32.totalorder %s292_s9, %s384_s10  ;;  %p390_p6 = scmp.lt.s32.totalorder %s384_s10, %s384_s10 }
  0x43   :  { %148 = vrot.lane.b32.xlu0 %v146_v18, %s417_s12  ;;  %156 = vrot.lane.b32.xlu1 %v154_v19, %s418_s15  ;;  %v201_v18 = vmul.f32 %v200_v14, %v487_v25 }
  0x44   :  { %p391_p7 = por %p390_p6, %p389_p5 }
  0x46   :  { %p392_p8 = pnand %p391_p7, %p385_p4 }
  0x47   :  { %177 = vrot.lane.b32.xlu0 %v175_v24, %s417_s12  ;;  %264 = vrot.lane.b32.xlu1 %v262_v27, %s417_s12 }
  0x4b   :  { %206 = vrot.lane.b32.xlu0 %v204_v29, %s417_s12  ;;  %272 = vrot.lane.b32.xlu1 %v270_v31, %s418_s15 }
  0x4f   :  { %185 = vrot.lane.b32.xlu0 %v183_v32, %s418_s15  ;;  %v77_v32 = vstv %s76_s29 }
  0x53   :  { %235 = vrot.lane.b32.xlu0 %v233_v35, %s417_s12 }
  0x57   :  { %214 = vrot.lane.b32.xlu0 %v212_v37, %s418_s15  ;;  %v135_v37 = vstv %s311_s4 }
  0x5b   :  { %243 = vrot.lane.b32.xlu0 %v241_v39, %s418_s15 }
  0xa9   :  { %v61_v44 = vpop.permute.xlu0 %60  ;;  %v91_v46 = vpop.permute.xlu1 %90 }
  0xaa   :  { %v63_v48 = vadd.f32 %v61_v44, %v55_v42  ;;  %v93_v50 = vadd.f32 %v91_v46, %v85_v45  ;;  %v164_v44 = vstv %s315_s0 }
  0xad   :  { %v69_v49 = vpop.permute.xlu0 %68  ;;  %v120_v52 = vpop.permute.xlu1 %119 }
  0xae   :  { %v71_v51 = vadd.f32 %v69_v49, %v63_v48  ;;  %v122_v53 = vadd.f32 %v120_v52, %v114_v47  ;;  %v193_v48 = vstv %s319_s5  ;;  %v222_v52 = vstv %s323_s6 }
  0xb0   :  { %v73_v55 = vsel %vm72_vm0, %v71_v51, -inf }
  0xb1   :  { %v99_v56 = vpop.permute.xlu0 %98  ;;  %74 = vmax.xlane.f32.xlu1 %v73_v55  ;;  %v128_v58 = vpop.permute.xlu1 %127  ;;  %v280_v55 = vstv %s331_s2 }
  0xb2   :  { %v101_v57 = vadd.f32 %v99_v56, %v93_v50  ;;  %v130_v60 = vadd.f32 %v128_v58, %v122_v53 }
  0xb4   :  { %v102_v61 = vsel %vm72_vm0, %v101_v57, -inf  ;;  %v131_v63 = vsel %vm72_vm0, %v130_v60, -inf  ;;  %v251_v57 = vstv %s327_s7 }
  0xb5   :  { %103 = vmax.xlane.f32.xlu0 %v102_v61  ;;  %v149_v62 = vpop.permute.xlu0 %148  ;;  %v157_v1 = vpop.permute.xlu1 %156  ;;  %132 = vmax.xlane.f32.xlu1 %v131_v63 }
  0xb6   :  { %v151_v0 = vadd.f32 %v149_v62, %v143_v59 }
  0xb8   :  { %v159_v3 = vadd.f32 %v157_v1, %v151_v0 }
  0xb9   :  { %v178_v5 = vpop.permute.xlu0 %177  ;;  %v265_v8 = vpop.permute.xlu1 %264 }
  0xba   :  { %v160_v6 = vsel %vm72_vm0, %v159_v3, -inf  ;;  %v267_v11 = vadd.f32 %v265_v8, %v259_v7  ;;  %v180_v13 = vadd.f32 %v178_v5, %v172_v9 }
  0xbb   :  { %161 = vmax.xlane.f32.xlu0 %v160_v6 }
  0xbd   :  { %v207_v10 = vpop.permute.xlu0 %206  ;;  %v273_v12 = vpop.permute.xlu1 %272 }
  0xbe   :  { %v275_v17 = vadd.f32 %v273_v12, %v267_v11  ;;  %v209_v24 = vadd.f32 %v207_v10, %v201_v18 }
  0xc0   :  { %v276_v22 = vsel %vm72_vm0, %v275_v17, -inf }
  0xc1   :  { %v186_v15 = vpop.permute.xlu0 %185 }
  0xc2   :  { %v188_v16 = vadd.f32 %v186_v15, %v180_v13 }
  0xc4   :  { %v189_v19 = vsel %vm72_vm0, %v188_v16, -inf }
  0xc5   :  { %v236_v23 = vpop.permute.xlu0 %235  ;;  %190 = vmax.xlane.f32.xlu1 %v189_v19 }
  0xc6   :  { %v238_v28 = vadd.f32 %v236_v23, %v230_v20 }
  0xc9   :  { %v215_v26 = vpop.permute.xlu0 %214  ;;  %277 = vmax.xlane.f32.xlu1 %v276_v22 }
  0xca   :  { %v217_v27 = vadd.f32 %v215_v26, %v209_v24 }
  0xcc   :  { %v218_v29 = vsel %vm72_vm0, %v217_v27, -inf }
  0xcd   :  { %219 = vmax.xlane.f32.xlu0 %v218_v29  ;;  %v244_v30 = vpop.permute.xlu0 %243 }
  0xce   :  { %v246_v31 = vadd.f32 %v244_v30, %v238_v28 }
  0xd0   :  { %v247_v25 = vsel %vm72_vm0, %v246_v31, -inf }
  0xd1   :  { %248 = vmax.xlane.f32.xlu0 %v247_v25 }
 0x13e   :  { %v75_v34 = vpop.xlane.xlu1 %74 }
 0x13f   :  { %v78_v35 = vadd.f32 %v77_v32, %v75_v34 }
 0x141   :  { %v79_v36 = vmax.f32 %v78_v35, 0.0 }
 0x142   :  { %v104_v38 = vpop.xlane.xlu0 %103  ;;  %v133_v40 = vpop.xlane.xlu1 %132 }
 0x143   :  { %81 = vst.msk [vmem:[#allocation9] sm:$0x3] %vm80_vm1, %v79_v36  ;;  %v107_v39 = vadd.f32 %v106_v33, %v104_v38  ;;  %v136_v41 = vadd.f32 %v135_v37, %v133_v40 }
 0x145   :  { %v108_v42 = vmax.f32 %v107_v39, 0.0  ;;  %v137_v43 = vmax.f32 %v136_v41, 0.0 }
 0x147   :  { %110 = vst.msk [vmem:[#allocation9] sm:$0x3] %vm109_vm2, %v108_v42 }
 0x148   :  { %139 = vst.msk [vmem:[#allocation9] sm:$0x3] %vm138_vm3, %v137_v43  ;;  %v162_v45 = vpop.xlane.xlu0 %161 }
 0x149   :  { %v165_v46 = vadd.f32 %v164_v44, %v162_v45 }
 0x14b   :  { %v166_v47 = vmax.f32 %v165_v46, 0.0 }
 0x14d   :  { %168 = vst.msk [vmem:[#allocation9] sm:$0x3] %vm167_vm4, %v166_v47 }
 0x152   :  { %v191_v49 = vpop.xlane.xlu1 %190 }
 0x153   :  { %v194_v50 = vadd.f32 %v193_v48, %v191_v49 }
 0x155   :  { %v195_v51 = vmax.f32 %v194_v50, 0.0 }
 0x156   :  { %v278_v56 = vpop.xlane.xlu1 %277 }
 0x157   :  { %197 = vst.msk [vmem:[#allocation9] sm:$0x3] %vm196_vm5, %v195_v51  ;;  %v281_v59 = vadd.f32 %v280_v55, %v278_v56 }
 0x159   :  { %v282_v63 = vmax.f32 %v281_v59, 0.0 }
 0x15a   :  { %v220_v53 = vpop.xlane.xlu0 %219 }
 0x15b   :  { %v223_v54 = vadd.f32 %v222_v52, %v220_v53 }
 0x15d   :  { %v224_v58 = vmax.f32 %v223_v54, 0.0 }
 0x15e   :  { %v249_v60 = vpop.xlane.xlu0 %248 }
 0x15f   :  { %v252_v61 = vadd.f32 %v251_v57, %v249_v60  ;;  %226 = vst.msk [vmem:[#allocation9] sm:$0x3] %vm225_vm6, %v224_v58 }
 0x161   :  { %v253_v62 = vmax.f32 %v252_v61, 0.0 }
 0x163   :  { %255 = vst.msk [vmem:[#allocation9] sm:$0x3] %vm254_vm7, %v253_v62 }
 0x164   :  { %284 = vst.msk [vmem:[#allocation9] sm:$0x3] %vm283_vm8, %v282_v63 }
 0x165   :  { %395 = shalt.err (!%p392_p8)
}
 0x166   :  { %s396_s13 = scalar_lea.hbm %s537_s3, 32 }
 0x167   :  { %p397_p9 = scmp.ne.s32.totalorder %s537_s3, %s396_s13  ;;  %p400_p10 = scmp.lt.u32.totalorder %s396_s13, %s537_s3 }
 0x169   :  { %p402_p11 = pnand %p400_p10, %p397_p9 }
 0x16b   :  { %405 = shalt.err (!%p402_p11)
}
 0x16c   :  { %294 = dma.vmem_to_hbm [thread:$0]  %s292_s9, 32, %s537_s3, [#allocation4]  }
 0x16d   :  { %412 = dma.done.wait [#allocation4], 32  }
 0x16e   :  { %413 = vsyncadd [#allocation4], 4294967264 }
 0x16f   :  { %298 = vsyncpa [#allocation3], 1 }
 0x170   :  { %299 = vsyncpa [#allocation4], 1 }
 0x171   :  { %300 = vsyncpa [#allocation5], 1 }
 0x172   :  { %301 = vsyncpa [#allocation8], 1 }

</bundles_post_ra>
